<compile_context>
chip_gen: v7x
topology: tpu7x:2x2x1
jax: 0.10.0
libtpu: 0.0.40
codegen_flags: <defaults>
</compile_context>

<pallas_src>
import jax
import jax.numpy as jnp
from jax.experimental import pallas as pl
from jax.experimental.pallas import tpu as pltpu

EPS = 1e-5


def _rn_b_kernel(x_ref, m_ref, p_ref, o_ref):
    # Blocks: x (Bt, C, T), m (Bt, 1, T), p (3, T), o (Bt, C, T).
    # All math is per-lane (the channel reduction is over the sublane axis), so
    # a ragged final spatial block only produces garbage in lanes whose writes
    # Pallas discards.  Keep this invariant if you edit the kernel.
    x = x_ref[...].astype(jnp.float32)        # (Bt, C, T)
    m0 = m_ref[...].astype(jnp.float32)       # (Bt, 1, T) channel-0 mask plane
    p = p_ref[...].astype(jnp.float32)        # (3, T) stacked folded params
    sbg = p[0:1, :]                           # 1 + bg_gamma        (1, T)
    sdiff = p[1:2, :]                         # fg_gamma - bg_gamma (1, T)
    bsum = p[2:3, :]                          # fg_beta + bg_beta   (1, T)

    c = x.shape[1]
    inv_c = 1.0 / c
    inv_cm1 = 1.0 / (c - 1)

    x0 = x[:, 0:1, :]                         # channel 0 of x
    a = x0 * m0                               # (x * mask1)[ch 0]; other ch are 0
    xb0 = x0 - a                              # (x * (1 - mask1))[ch 0]

    # --- pono(x * mask1): only channel 0 nonzero -> closed-form stats -------
    #   mean = a/C, unbiased var = a^2/C
    inv_std_f = jax.lax.rsqrt(a * a * inv_c + EPS)            # (Bt, 1, T)
    f_rest = (-inv_c) * a * inv_std_f                         # channels >= 1
    f_ch0 = ((c - 1.0) * inv_c) * a * inv_std_f               # channel 0

    # --- pono(x * (1 - mask1)): single-pass sum / sum-of-squares over C -----
    s1 = jnp.sum(x, axis=1, keepdims=True) - a
    s2 = jnp.sum(x * x, axis=1, keepdims=True) - x0 * x0 + xb0 * xb0
    mean_b = s1 * inv_c
    var_b = jnp.maximum((s2 - s1 * mean_b) * inv_cm1, 0.0)    # unbiased, clamped
    inv_std_b = jax.lax.rsqrt(var_b + EPS)

    # Generic-channel result (exact for channels >= 1), stored everywhere ...
    rn_rest = f_rest + (x - mean_b) * inv_std_b               # (Bt, C, T)
    o_ref[...] = (rn_rest * sbg + bsum).astype(o_ref.dtype)
    # ... then channel 0 overwritten with its exact (Bt, 1, T) expression.
    rn0 = f_ch0 + (xb0 - mean_b) * inv_std_b
    o_ref[:, 0:1, :] = (rn0 * (sbg + m0 * sdiff) + bsum).astype(o_ref.dtype)


def _physical_vmem_bytes():
    """Trace-time VMEM capacity query with a conservative (v7x) fallback."""
    try:
        info = pltpu.get_tpu_info()
        for attr in ("vmem_capacity_bytes", "vmem_size_bytes", "vmem_bytes"):
            v = getattr(info, attr, None)
            if v:
                return int(v)
    except Exception:
        pass
    return 64 << 20  # v7x per-TensorCore VMEM (smallest of the supported chips)


def rn_b_forward(x, mask, fg_gamma, fg_beta, bg_gamma, bg_beta):
    """x: (B, C, M, N); mask: (Bm, 1, Mm, W) with W in {1, N}.
    fg/bg gamma/beta: (feature_channels,) with feature_channels == M (the
    module's [None, :, None] broadcast quirk)."""
    B, C, M, N = x.shape
    dtype = x.dtype
    S = M * N

    assert C >= 2, "unbiased variance over channels requires C >= 2"
    assert fg_gamma.shape == (M,) and fg_beta.shape == (M,), \
        "module broadcast quirk requires feature_channels == M"
    assert bg_gamma.shape == (M,) and bg_beta.shape == (M,), \
        "module broadcast quirk requires feature_channels == M"
    # TODO(synk): masks with more than one channel (mask.shape[1] > 1) are not
    # supported by this fast path (module contract is mask: (B,1,H,W)).
    assert mask.shape[1] == 1, "mask must have a single channel"

    # --- channel-0 mask plane with the reference copy-loop bmin/kmin quirks --
    if mask.shape[0] >= B and mask.shape[2] >= M:
        # Common case: no truncation -> no zeros + scatter round trip.
        m_plane = jnp.broadcast_to(mask[:B, 0, :M, :].astype(dtype), (B, M, N))
    else:
        bmin = min(mask.shape[0], B)
        kmin = min(M, mask.shape[2])
        m_plane = jnp.zeros((B, M, N), dtype=dtype)
        src = jnp.broadcast_to(mask[:bmin, 0, :kmin, :].astype(dtype),
                               (bmin, kmin, N))
        m_plane = m_plane.at[:bmin, :kmin, :].set(src)
    m_plane = m_plane.reshape(B, 1, S)

    x2 = x.reshape(B, C, S)   # lane-dense spatial layout (free reshape)

    # --- fold the fg/bg affine into 3 planes, stacked into one array --------
    params = jnp.stack([1.0 + bg_gamma,            # bg scale
                        fg_gamma - bg_gamma,       # fg scale - bg scale
                        fg_beta + bg_beta],        # summed betas
                       axis=0).astype(dtype)       # (3, M)
    params = jnp.broadcast_to(params[:, :, None], (3, M, N)).reshape(3, S)

    # --- VMEM-budget-driven tiling (per TPU generation) ----------------------
    itemsize = jnp.dtype(dtype).itemsize
    phys = _physical_vmem_bytes()
    vmem_limit = min((phys * 3) // 4, 96 << 20)    # v7x -> ~48 MiB, v5e/v6e -> 96 MiB
    block_budget = (vmem_limit * 4) // 5           # headroom for compiler scratch

    def per_lane_bytes(bt):
        # Double-buffered: x in-block + out-block + mask-block + (3, T) params.
        return 2 * itemsize * (2 * bt * C + bt + 3)

    t_cap = block_budget // per_lane_bytes(1)
    t_cap = max(128, (t_cap // 128) * 128)
    if S <= t_cap:
        T = S                 # full spatial extent in one block (any S allowed)
        grid_s = 1
    else:
        T = t_cap             # multiple of 128; ragged tail handled by masking
        grid_s = pl.cdiv(S, T)

    # Optional batch grouping: only when spatial fits in one tile and B is big;
    # keep >= 2 grid steps so megacore (v7x) can still split the parallel axis.
    Bt = 1
    if grid_s == 1 and B >= 4:
        for cand in range(B // 2, 1, -1):
            if B % cand == 0 and per_lane_bytes(cand) * T <= block_budget:
                Bt = cand
                break

    grid = (B // Bt, grid_s)
    x_blk = pl.BlockSpec((Bt, C, T), lambda b, s: (b, 0, s))
    m_blk = pl.BlockSpec((Bt, 1, T), lambda b, s: (b, 0, s))
    p_blk = pl.BlockSpec((3, T), lambda b, s: (0, s))

    out = pl.pallas_call(
        _rn_b_kernel,
        out_shape=jax.ShapeDtypeStruct((B, C, S), dtype),
        grid_spec=pltpu.PrefetchScalarGridSpec(
            num_scalar_prefetch=0,
            grid=grid,
            in_specs=[x_blk, m_blk, p_blk],
            out_specs=x_blk,
        ),
        compiler_params=pltpu.CompilerParams(
            dimension_semantics=("parallel", "parallel"),
            vmem_limit_bytes=int(vmem_limit)),
    )(x2, m_plane, params)

    return out.reshape(B, C, M, N)


def rn_b_reference(x, mask, fg_gamma, fg_beta, bg_gamma, bg_beta):
    """Pure-JAX transcription of the PyTorch forward (two-pass PONO)."""
    B, C, M, N = x.shape
    bmin = min(mask.shape[0], B)
    jmin = min(C, mask.shape[1])
    kmin = min(M, mask.shape[2])
    mask1 = jnp.zeros(x.shape, dtype=x.dtype)
    mask1 = mask1.at[:bmin, :jmin, :kmin, :].set(
        jnp.broadcast_to(mask[:bmin, :jmin, :kmin, :].astype(x.dtype),
                         (bmin, jmin, kmin, N)))

    def pono(v):
        mean = jnp.mean(v, axis=1, keepdims=True)
        var = jnp.sum((v - mean) ** 2, axis=1, keepdims=True) / (C - 1)
        std = jnp.sqrt(var + EPS)
        return (v - mean) / std

    rn = pono(x * mask1) + pono(x * (1.0 - mask1))
    fg = rn * mask1 * (1.0 + fg_gamma)[None, None, :, None] + fg_beta[None, None, :, None]
    bg = rn * (1.0 - mask1) * (1.0 + bg_gamma)[None, None, :, None] + bg_beta[None, None, :, None]
    return fg + bg


if __name__ == "__main__":
    # feature_channels must equal M for the original module's broadcast to be valid.
    B, C, M, N = 2, 8, 16, 64
    feature_channels = M

    key = jax.random.PRNGKey(0)
    kx, km, k1, k2, k3, k4 = jax.random.split(key, 6)

    x = jax.random.normal(kx, (B, C, M, N), dtype=jnp.float32)
    mask = (jax.random.uniform(km, (B, 1, M, N)) > 0.5).astype(jnp.float32)

    fg_gamma = 0.1 * jax.random.normal(k1, (feature_channels,), dtype=jnp.float32)
    fg_beta = 0.1 * jax.random.normal(k2, (feature_channels,), dtype=jnp.float32)
    bg_gamma = 0.1 * jax.random.normal(k3, (feature_channels,), dtype=jnp.float32)
    bg_beta = 0.1 * jax.random.normal(k4, (feature_channels,), dtype=jnp.float32)

    out = jax.block_until_ready(
        rn_b_forward(x, mask, fg_gamma, fg_beta, bg_gamma, bg_beta))
    ref = jax.block_until_ready(
        rn_b_reference(x, mask, fg_gamma, fg_beta, bg_gamma, bg_beta))

    assert out.shape == (B, C, M, N)
    assert jnp.allclose(out, ref, atol=2e-4, rtol=2e-4), "mismatch vs reference"
    print("KERNEL_OK")
</pallas_src>

<mosaic_0001>
module attributes {stable_mosaic.version = 11 : i64} {
  func.func @_rn_b_kernel(%arg0: i32, %arg1: i32, %arg2: memref<1x8x1024xf32, #tpu.memory_space<vmem>>, %arg3: memref<1x1x1024xf32, #tpu.memory_space<vmem>>, %arg4: memref<3x1024xf32, #tpu.memory_space<vmem>>, %arg5: memref<1x8x1024xf32, #tpu.memory_space<vmem>>) attributes {dimension_semantics = [#tpu.dimension_semantics<parallel>, #tpu.dimension_semantics<parallel>], iteration_bounds = array<i64: 2, 1>, scalar_prefetch = 0 : i64, scratch_operands = 0 : i64, tpu.core_type = #tpu.core_type<tc>, window_params = [{transform_indices = @transform_0, window_bounds = array<i64: 1, 8, 1024>}, {transform_indices = @transform_1, window_bounds = array<i64: 1, 1, 1024>}, {transform_indices = @transform_2, window_bounds = array<i64: 3, 1024>}, {transform_indices = @transform_3, window_bounds = array<i64: 1, 8, 1024>}]} {
    %c0 = arith.constant 0 : index
    %c0_0 = arith.constant 0 : index
    %c0_1 = arith.constant 0 : index
    %0 = vector.load %arg2[%c0, %c0_0, %c0_1] : memref<1x8x1024xf32, #tpu.memory_space<vmem>>, vector<1x8x1024xf32>
    %c0_2 = arith.constant 0 : index
    %c0_3 = arith.constant 0 : index
    %c0_4 = arith.constant 0 : index
    %1 = vector.load %arg3[%c0_2, %c0_3, %c0_4] : memref<1x1x1024xf32, #tpu.memory_space<vmem>>, vector<1x1x1024xf32>
    %c0_5 = arith.constant 0 : index
    %c0_6 = arith.constant 0 : index
    %2 = vector.load %arg4[%c0_5, %c0_6] : memref<3x1024xf32, #tpu.memory_space<vmem>>, vector<3x1024xf32>
    %3 = vector.extract_strided_slice %2 {offsets = [0, 0], sizes = [1, 1024], strides = [1, 1]} : vector<3x1024xf32> to vector<1x1024xf32>
    %4 = vector.extract_strided_slice %2 {offsets = [1, 0], sizes = [1, 1024], strides = [1, 1]} : vector<3x1024xf32> to vector<1x1024xf32>
    %5 = vector.extract_strided_slice %2 {offsets = [2, 0], sizes = [1, 1024], strides = [1, 1]} : vector<3x1024xf32> to vector<1x1024xf32>
    %6 = vector.extract_strided_slice %0 {offsets = [0, 0, 0], sizes = [1, 1, 1024], strides = [1, 1, 1]} : vector<1x8x1024xf32> to vector<1x1x1024xf32>
    %7 = arith.mulf %6, %1 : vector<1x1x1024xf32>
    %8 = arith.subf %6, %7 : vector<1x1x1024xf32>
    %9 = arith.mulf %7, %7 : vector<1x1x1024xf32>
    %cst = arith.constant 1.250000e-01 : f32
    %10 = vector.broadcast %cst : f32 to vector<1x1x1024xf32>
    %11 = arith.mulf %9, %10 : vector<1x1x1024xf32>
    %cst_7 = arith.constant 9.99999974E-6 : f32
    %12 = vector.broadcast %cst_7 : f32 to vector<1x1x1024xf32>
    %13 = arith.addf %11, %12 : vector<1x1x1024xf32>
    %14 = math.rsqrt %13 : vector<1x1x1024xf32>
    %cst_8 = arith.constant -1.250000e-01 : f32
    %15 = vector.broadcast %cst_8 : f32 to vector<1x1x1024xf32>
    %16 = arith.mulf %15, %7 : vector<1x1x1024xf32>
    %17 = arith.mulf %16, %14 : vector<1x1x1024xf32>
    %cst_9 = arith.constant 8.750000e-01 : f32
    %18 = vector.broadcast %cst_9 : f32 to vector<1x1x1024xf32>
    %19 = arith.mulf %18, %7 : vector<1x1x1024xf32>
    %20 = arith.mulf %19, %14 : vector<1x1x1024xf32>
    %cst_10 = arith.constant dense<0.000000e+00> : vector<1x1024xf32>
    %21 = vector.multi_reduction <add>, %0, %cst_10 [1] : vector<1x8x1024xf32> to vector<1x1024xf32>
    %22 = vector.shape_cast %21 : vector<1x1024xf32> to vector<1x1x1024xf32>
    %23 = arith.subf %22, %7 : vector<1x1x1024xf32>
    %24 = arith.mulf %0, %0 : vector<1x8x1024xf32>
    %cst_11 = arith.constant dense<0.000000e+00> : vector<1x1024xf32>
    %25 = vector.multi_reduction <add>, %24, %cst_11 [1] : vector<1x8x1024xf32> to vector<1x1024xf32>
    %26 = vector.shape_cast %25 : vector<1x1024xf32> to vector<1x1x1024xf32>
    %27 = arith.mulf %6, %6 : vector<1x1x1024xf32>
    %28 = arith.subf %26, %27 : vector<1x1x1024xf32>
    %29 = arith.mulf %8, %8 : vector<1x1x1024xf32>
    %30 = arith.addf %28, %29 : vector<1x1x1024xf32>
    %cst_12 = arith.constant 1.250000e-01 : f32
    %31 = vector.broadcast %cst_12 : f32 to vector<1x1x1024xf32>
    %32 = arith.mulf %23, %31 : vector<1x1x1024xf32>
    %33 = arith.mulf %23, %32 : vector<1x1x1024xf32>
    %34 = arith.subf %30, %33 : vector<1x1x1024xf32>
    %cst_13 = arith.constant 0.142857149 : f32
    %35 = vector.broadcast %cst_13 : f32 to vector<1x1x1024xf32>
    %36 = arith.mulf %34, %35 : vector<1x1x1024xf32>
    %cst_14 = arith.constant 0.000000e+00 : f32
    %37 = vector.broadcast %cst_14 : f32 to vector<1x1x1024xf32>
    %38 = arith.maximumf %36, %37 : vector<1x1x1024xf32>
    %cst_15 = arith.constant 9.99999974E-6 : f32
    %39 = vector.broadcast %cst_15 : f32 to vector<1x1x1024xf32>
    %40 = arith.addf %38, %39 : vector<1x1x1024xf32>
    %41 = math.rsqrt %40 : vector<1x1x1024xf32>
    %42 = vector.broadcast %32 : vector<1x1x1024xf32> to vector<1x8x1024xf32>
    %43 = arith.subf %0, %42 : vector<1x8x1024xf32>
    %44 = vector.broadcast %41 : vector<1x1x1024xf32> to vector<1x8x1024xf32>
    %45 = arith.mulf %43, %44 : vector<1x8x1024xf32>
    %46 = vector.broadcast %17 : vector<1x1x1024xf32> to vector<1x8x1024xf32>
    %47 = arith.addf %46, %45 : vector<1x8x1024xf32>
    %48 = vector.shape_cast %3 : vector<1x1024xf32> to vector<1x1x1024xf32>
    %49 = vector.broadcast %48 : vector<1x1x1024xf32> to vector<1x8x1024xf32>
    %50 = arith.mulf %47, %49 : vector<1x8x1024xf32>
    %51 = vector.shape_cast %5 : vector<1x1024xf32> to vector<1x1x1024xf32>
    %52 = vector.broadcast %51 : vector<1x1x1024xf32> to vector<1x8x1024xf32>
    %53 = arith.addf %50, %52 : vector<1x8x1024xf32>
    %c0_16 = arith.constant 0 : index
    %c0_17 = arith.constant 0 : index
    %c0_18 = arith.constant 0 : index
    %54 = vector.load %arg5[%c0_16, %c0_17, %c0_18] : memref<1x8x1024xf32, #tpu.memory_space<vmem>>, vector<1x8x1024xf32>
    tpu.vector_store %arg5[%c0_16, %c0_17, %c0_18], %53 {strides = array<i32>} : memref<1x8x1024xf32, #tpu.memory_space<vmem>>, vector<1x8x1024xf32>,
    %55 = arith.subf %8, %32 : vector<1x1x1024xf32>
    %56 = arith.mulf %55, %41 : vector<1x1x1024xf32>
    %57 = arith.addf %20, %56 : vector<1x1x1024xf32>
    %58 = vector.shape_cast %4 : vector<1x1024xf32> to vector<1x1x1024xf32>
    %59 = arith.mulf %1, %58 : vector<1x1x1024xf32>
    %60 = vector.shape_cast %3 : vector<1x1024xf32> to vector<1x1x1024xf32>
    %61 = arith.addf %60, %59 : vector<1x1x1024xf32>
    %62 = arith.mulf %57, %61 : vector<1x1x1024xf32>
    %63 = vector.shape_cast %5 : vector<1x1024xf32> to vector<1x1x1024xf32>
    %64 = arith.addf %62, %63 : vector<1x1x1024xf32>
    %c0_19 = arith.constant 0 : index
    %c0_20 = arith.constant 0 : index
    %c0_21 = arith.constant 0 : index
    %65 = vector.load %arg5[%c0_19, %c0_20, %c0_21] : memref<1x8x1024xf32, #tpu.memory_space<vmem>>, vector<1x1x1024xf32>
    tpu.vector_store %arg5[%c0_19, %c0_20, %c0_21], %64 {strides = array<i32>} : memref<1x8x1024xf32, #tpu.memory_space<vmem>>, vector<1x1x1024xf32>,
    return
  }
  func.func @transform_0(%arg0: i32, %arg1: i32) -> (i32, i32, i32) {
    %c0_i32 = arith.constant 0 : i32
    %c0_i32_0 = arith.constant 0 : i32
    return %arg0, %c0_i32, %arg1 : i32, i32, i32
  }
  func.func @transform_1(%arg0: i32, %arg1: i32) -> (i32, i32, i32) {
    %c0_i32 = arith.constant 0 : i32
    %c0_i32_0 = arith.constant 0 : i32
    return %arg0, %c0_i32, %arg1 : i32, i32, i32
  }
  func.func @transform_2(%arg0: i32, %arg1: i32) -> (i32, i32) {
    %c0_i32 = arith.constant 0 : i32
    %c0_i32_0 = arith.constant 0 : i32
    return %c0_i32, %arg1 : i32, i32
  }
  func.func @transform_3(%arg0: i32, %arg1: i32) -> (i32, i32, i32) {
    %c0_i32 = arith.constant 0 : i32
    %c0_i32_0 = arith.constant 0 : i32
    return %arg0, %c0_i32, %arg1 : i32, i32, i32
  }
}

</mosaic_0001>

<bundles_post_ra>
// kernel: tpu_custom_call.1
= control target key start
LH: loop header
LB: loop body
LE: loop exit
PB: predicated region body
PF: predicated region fallthrough
CT: control target
= control target key end

     0   :  { %s2392_s0 = inlined_call_operand.hbm [shape: f32[2,8,1024], index: 0, kind: input, shape index: {}]   ;;  %s2393_s1 = inlined_call_operand.hbm [shape: f32[2,1,1024], index: 1, kind: input, shape index: {}]   ;;  %s2394_s2 = inlined_call_operand.hbm [shape: f32[3,1024], index: 2, kind: input, shape index: {}]   ;;  %s2395_s3 = inlined_call_operand.hbm [shape: f32[2,8,1024], index: 3, kind: output, shape index: {}]  }
   0x1   :  { %2400 = sst [smem:[#allocation13_spill]] %s2392_s0 }
   0x2   :  { %8 = vsyncpa [#allocation3], 0 }
   0x3   :  { %10 = vsyncpa [#allocation3 + $0x1], 0 }
   0x4   :  { %11 = vsyncpa [#allocation6], 0 }
   0x5   :  { %13 = vsyncpa [#allocation6 + $0x1], 0 }
   0x6   :  { %14 = vsyncpa [#allocation4], 0 }
   0x7   :  { %16 = vsyncpa [#allocation4 + $0x1], 0  ;;  %s1603_s12 = smov 0   ;;  %s1605_s13 = smov 0  }
   0x8   :  { %s1607_s14 = smov 0   ;;  %s1609_s15 = smov 0  }
   0x9   :  { %s1611_s16 = smov 0   ;;  %s1613_s17 = smov 0  }
   0xa LB: > { %s1634_s18 = sadd.s32 4294967295, %s1572_s17   ;;  %s1256_s19 = sadd.s32 4294967294, %s1572_s17   ;;  %s1572_s17 = sphi %s1613_s17, %s22_s17   ;;  %s1568_s16 = sphi %s1611_s16, %s2424_s16   ;;  %s1564_s15 = sphi %s1609_s15, %s2423_s15   ;;  %s1560_s14 = sphi %s1607_s14, %s2422_s14   ;;  %s1556_s13 = sphi %s1605_s13, %s2421_s13   ;;  %s1552_s12 = sphi %s1603_s12, %s2420_s12  }
   0xb   : > { %s43_s20 = sadd.s32 1, %s1560_s14  ;;  %p50_p0 = scmp.ne.s32.totalorder %s1560_s14, %s1556_s13 }
   0xc   : > { %p56_p1 = scmp.ne.s32.totalorder %s1556_s13, %s1552_s12  ;;  %p2396_p2 = scmp.eq.s32.totalorder %s1634_s18, 0 }
   0xd   : > { %p136_p3 = scmp.eq.s32.totalorder %s1634_s18, 1  ;;  %p142_p4 = scmp.eq.s32.totalorder %s1256_s19, 1 }
   0xe   : > { %p1646_p5 = por %p2396_p2, %p56_p1  ;;  %p1257_p6 = scmp.ge.s32.totalorder %s1572_s17, 1 }
   0xf   : > { %p1654_p7 = por %p136_p3, %p50_p0  ;;  %p1658_p8 = por %p142_p4, %p56_p1 }
  0x10   : > { %s2401_s21 = scalar_select %p1646_p5, 1, 0 }
  0x11   : > { %s2402_s22 = scalar_select %p1654_p7, 1, 0 }
  0x12   : > { %s2403_s23 = scalar_select %p1658_p8, 1, 0 }
  0x13   : > { %p149_p9 = scmp.lt.s32.totalorder %s1572_s17, 3  ;;  %s1574_s25 = smov [#allocation7]  }
  0x14   : > { %s165_s26 = sshll.u32 %s1574_s25, 4  ;;  %s34_s27 = sadd.s32 1, %s1568_s16  ;;  %s166_s26 = int_to_ptr.vmem [resolvable:$true] %s165_s26 }
  0x15   : > { %p1664_p11 = pnand %p1257_p6, %p149_p9  ;;  %p51_p13 = scmp.eq.s32.totalorder %s1572_s17, 0 }
  0x16   : > { %p1678_p1 = scmp.ge.s32.totalorder %s34_s27, 2  ;;  %s1691_s4 = sand.u32 1, %s1560_s14  }
  0x17   : > { %s2404_s24 = scalar_select %p1664_p11, 1, 0 }
  0x18   : > { %p1289_p12 = pneg %p1664_p11  ;;  %p1685_p4 = por %p51_p13, %p50_p0 }
  0x19   : > { %s2406_s29 = scalar_select %p1678_p1, 1, 0 }
  0x1a   : > { %p1674_p3 = pnand %p1289_p12, %p2396_p2  ;;  %s1394_s7 = scalar_lea.hbm %s2394_s2, 512 }
  0x1b   : > { %s2407_s30 = scalar_select %p1685_p4, 1, 0 }
  0x1c   : > { %p1395_p9 = scmp.ne.s32.totalorder %s2394_s2, %s1394_s7  ;;  %p1396_p12 = pneg %p1674_p3 }
  0x1d   : > { %p1401_p0 = scmp.lt.u32.totalorder %s1394_s7, %s2394_s2 }
  0x1e   : > { %p1397_p10 = pnand %p1396_p12, %p1395_p9 }
  0x20   : > { %p1398_p2 = pneg %p1397_p10 }
  0x22   : > { %p1403_p13 = pnand %p1401_p0, %p1398_p2 }
  0x24   : > { %1406 = shalt.err (!%p1403_p13)
}
  0x25   : > { %s1407_s19 = scalar_lea.vmem %s166_s26, 512  ;;  %p1415_p5 = scmp.lt.s32.totalorder %s166_s26, %s166_s26 }
  0x26   : > { %p1408_p6 = scmp.ne.s32.totalorder %s166_s26, %s1407_s19  ;;  %p1416_p11 = scmp.lt.s32.totalorder %s1407_s19, %s1407_s19 }
  0x28   : > { %p1410_p8 = pnand %p1408_p6, %p1396_p12  ;;  %p1417_p4 = por %p1416_p11, %p1415_p5 }
  0x2a   : > { %p1411_p7 = pneg %p1410_p8 }
  0x2c   : > { %p1418_p1 = pnand %p1417_p4, %p1411_p7 }
  0x2e   : > { %1421 = shalt.err (!%p1418_p1)
}
  0x2f   : > { %1292 = dma.hbm_to_vmem [thread:$0]  (!%p1674_p3), %s2394_s2, 512, %s166_s26, [#allocation6]  }
  0x30   : > { %p2408_p2 = scmp.ne.s32.totalorder %s2406_s29, 0  ;;  %s1260_s28 = sshll.u32 %s1691_s4, 6 }
  0x31   : > { %s1276_s7 = sshll.u32 %s1568_s16, 10  ;;  %s2409_s0 = sld [smem:[#allocation13_spill]] }
  0x32   : > { %s2426_s27 = smov (%p2408_p2, %s34_s27), 0  ;;  %s180_s11 = scalar_lea.vmem [#allocation2], %s1260_s28 }
  0x33   : > { %s38_s6 = ssub.s32 %s1568_s16, %s2426_s27  ;;  %s190_s19 = sshll.u32 %s180_s11, 4  ;;  %s1727_s19 = int_to_ptr.vmem [resolvable:$true] %s190_s19 }
  0x34   : > { %p41_p5 = scmp.eq.s32.totalorder %s38_s6, 0  ;;  %p2410_p7 = scmp.ne.s32.totalorder %s2407_s30, 0 }
  0x35   : > { %p2411_p8 = scmp.lt.s32.totalorder %s1572_s17, 2  ;;  %s197_s25 = sand.u32 1, %s1572_s17  }
  0x36   : > { %s1725_s26 = scalar_select %p41_p5, %s1560_s14, %s43_s20  }
  0x37   : > { %s1720_s10 = scalar_lea.hbm %s2409_s0, %s1276_s7  ;;  %p1733_p10 = pnand %p2411_p8, %p2410_p7 }
  0x38   : > { %s1263_s5 = sshll.u32 %s1691_s4, 3  ;;  %s177_s6 = scalar_lea.sflag [#allocation3], %s1691_s4 }
  0x39   : > { %s1422_s7 = scalar_lea.hbm %s1720_s10, 1024  ;;  %p1424_p3 = pneg %p1733_p10 }
  0x3a   : > { %p1423_p11 = scmp.ne.s32.totalorder %s1720_s10, %s1422_s7  ;;  %s1427_s28 = scalar_lea.hbm %s2409_s0, 2048 }
  0x3b   : > { %p1428_p6 = scmp.lt.u32.totalorder %s1720_s10, %s2409_s0  ;;  %p1429_p9 = scmp.lt.u32.totalorder %s1427_s28, %s1422_s7 }
  0x3c   : > { %p1425_p1 = pnand %p1424_p3, %p1423_p11  ;;  %p1431_p0 = scmp.lt.u32.totalorder %s1422_s7, %s1720_s10 }
  0x3d   : > { %p1430_p12 = por %p1429_p9, %p1428_p6 }
  0x3e   : > { %p1426_p4 = pneg %p1425_p1 }
  0x3f   : > { %p1432_p13 = por %p1431_p0, %p1430_p12 }
  0x41   : > { %p1433_p2 = pnand %p1432_p13, %p1426_p4 }
  0x43   : > { %1436 = shalt.err (!%p1433_p2)
}
  0x44   : > { %s1437_s11 = scalar_lea.vmem %s1727_s19, 1024  ;;  %s1575_s20 = smov [#allocation2]  }
  0x45   : > { %p1438_p5 = scmp.ne.s32.totalorder %s1727_s19, %s1437_s11  ;;  %s1442_s30 = sshll.u32 %s1575_s20, 4  ;;  %s1443_s30 = int_to_ptr.vmem [resolvable:$false] %s1442_s30 }
  0x46   : > { %s1444_s8 = scalar_lea.vmem %s1443_s30, 2048  ;;  %p1445_p11 = scmp.lt.s32.totalorder %s1727_s19, %s1443_s30 }
  0x47   : > { %p1440_p7 = pnand %p1438_p5, %p1424_p3  ;;  %p1446_p1 = scmp.lt.s32.totalorder %s1444_s8, %s1437_s11 }
  0x49   : > { %p1441_p8 = pneg %p1440_p7  ;;  %p1447_p6 = por %p1446_p1, %p1445_p11 }
  0x4b   : > { %p1448_p9 = pnand %p1447_p6, %p1441_p8 }
  0x4d   : > { %1451 = shalt.err (!%p1448_p9)
}
  0x4e   : > { %1296 = dma.hbm_to_vmem [thread:$0]  (!%p1733_p10), %s1720_s10, 1024, %s1727_s19, %s177_s6  }
  0x4f   : > { %s1277_s7 = sshll.u32 %s1568_s16, 7  ;;  %s201_s11 = scalar_lea.vmem [#allocation5], %s1263_s5 }
  0x50   : > { %s1769_s20 = scalar_lea.hbm %s2393_s1, %s1277_s7  ;;  %s211_s30 = sshll.u32 %s201_s11, 4  ;;  %s212_s30 = int_to_ptr.vmem [resolvable:$true] %s211_s30 }
  0x51   : > { %s198_s8 = scalar_lea.sflag [#allocation6], %s197_s25  ;;  %s1452_s0 = scalar_lea.hbm %s1769_s20, 128 }
  0x52   : > { %p1453_p4 = scmp.ne.s32.totalorder %s1769_s20, %s1452_s0  ;;  %s1457_s6 = scalar_lea.hbm %s2393_s1, 256 }
  0x53   : > { %p1458_p13 = scmp.lt.u32.totalorder %s1769_s20, %s2393_s1  ;;  %p1459_p2 = scmp.lt.u32.totalorder %s1457_s6, %s1452_s0 }
  0x54   : > { %p1455_p12 = pnand %p1453_p4, %p1424_p3  ;;  %p1461_p7 = scmp.lt.u32.totalorder %s1452_s0, %s1769_s20 }
  0x55   : > { %p1460_p5 = por %p1459_p2, %p1458_p13 }
  0x56   : > { %p1456_p0 = pneg %p1455_p12 }
  0x57   : > { %p1462_p8 = por %p1461_p7, %p1460_p5 }
  0x59   : > { %p1463_p11 = pnand %p1462_p8, %p1456_p0 }
  0x5b   : > { %1466 = shalt.err (!%p1463_p11)
}
  0x5c   : > { %s1467_s25 = scalar_lea.vmem %s212_s30, 128  ;;  %s1576_s5 = smov [#allocation5]  }
  0x5d   : > { %p1468_p1 = scmp.ne.s32.totalorder %s212_s30, %s1467_s25  ;;  %s1472_s28 = sshll.u32 %s1576_s5, 4  ;;  %s1473_s28 = int_to_ptr.vmem [resolvable:$false] %s1472_s28 }
  0x5e   : > { %s1474_s9 = scalar_lea.vmem %s1473_s28, 256  ;;  %p1475_p4 = scmp.lt.s32.totalorder %s212_s30, %s1473_s28 }
  0x5f   : > { %p1470_p6 = pnand %p1468_p1, %p1424_p3  ;;  %p1476_p12 = scmp.lt.s32.totalorder %s1474_s9, %s1467_s25 }
  0x61   : > { %p1471_p9 = pneg %p1470_p6  ;;  %p1477_p2 = por %p1476_p12, %p1475_p4 }
  0x63   : > { %p1478_p13 = pnand %p1477_p2, %p1471_p9 }
  0x65   : > { %1481 = shalt.err (!%p1478_p13)
}
  0x66   : > { %1299 = dma.hbm_to_vmem [thread:$0]  (!%p1733_p10), %s1769_s20, 128, %s212_s30, %s198_s8  }
  0x67   : > { %p2413_p0 = scmp.ne.s32.totalorder %s2404_s24, 0 }
  0x68   : > { %s1797_s0 = sand.u32 (!%p2413_p0), 1, %s1556_s13   ;;  %p2414_p3 = scmp.ne.s32.totalorder (!%p2413_p0), %s2401_s21, 0 }
  0x69   : > { %220 = sbr.rel (%p2413_p0) target bundleno = 274 (0x112), region = 32  ;;  %s1267_s11 = sshll.u32 (!%p2413_p0), %s1797_s0, 6 }
  0x6a   : > { %s223_s10 = scalar_lea.sflag (!%p2413_p0), [#allocation3], %s1797_s0  ;;  %s1803_s19 = scalar_lea.vmem (!%p2413_p0), [#allocation2], %s1267_s11 }
  0x70   : > { %1535 = dma.done.wait (%p2414_p3), %s223_s10, 1024  }
  0x71   : > { %1537 = vsyncadd (%p2414_p3), %s223_s10, 4294966272  ;;  %s231_s24 = sand.u32 1, %s1634_s18   ;;  %s1268_s29 = sshll.u32 %s1797_s0, 3 }
  0x72   : > { %s232_s20 = scalar_lea.sflag [#allocation6], %s231_s24  ;;  %s235_s30 = scalar_lea.vmem [#allocation5], %s1268_s29 }
  0x73   : > { %1539 = dma.done.wait (%p2414_p3), %s232_s20, 128  }
  0x74   : > { %1541 = vsyncadd (%p2414_p3), %s232_s20, 4294967168  ;;  %p2415_p10 = scmp.eq.s32.totalorder %s1634_s18, 0 }
  0x76   : > { %1543 = dma.done.wait (%p2415_p10), [#allocation6], 512   ;;  %p2416_p5 = pmov %p2415_p10 }
  0x77   : > { %v285_v0 = vlaneseq  ;;  %v1577_v1 = vmov 1966171168   ;;  %v1828_v7 = vld [vmem:[%s1803_s19] sm:$0xff]  ;;  %v1832_v9 = vld [vmem:[#allocation7] sm:$0x77]  ;;  %v1862_v24 = vld [vmem:[%s1803_s19 + $0x8] sm:$0xff] }
  0x78   : > { %1545 = vsyncadd (%p2416_p5), [#allocation6], 4294966784  ;;  %v914_v2 = vunpack.c.l.s4 %v1577_v1  ;;  %v1830_v8 = vld [vmem:[%s235_s30] sm:$0xff]  ;;  %v1835_v11 = vld [vmem:[#allocation7 + $0x8] sm:$0x77]  ;;  %v1845_v15 = vmul.f32 %v1828_v7, %v1828_v7  ;;  %v405_v16 = vrot.slane %v1828_v7, 4  ;;  %v1874_v38 = vmul.f32 %v1862_v24, %v1862_v24 }
  0x79   : > { %v1819_v3 = vshrl.u32 %v285_v0, 7  ;;  %v1837_v12 = vld [vmem:[#allocation7 + $0x10] sm:$0x77]  ;;  %v1839_v13 = vld [vmem:[#allocation7 + $0x18] sm:$0x77]  ;;  %v1578_v29 = vmov 286326784  }
  0x7a   : > { %v915_v4 = vunpack.c.0.s8 %v914_v2  ;;  %v469_v18 = vrot.slane %v1845_v15, 4  ;;  %v406_v21 = vadd.f32 %v405_v16, %v1828_v7  ;;  %v962_v30 = vunpack.c.l.s4 %v1578_v29  ;;  %v1899_v62 = vld [vmem:[%s1803_s19 + $0x10] sm:$0xff]  ;;  %s2059_s18 = scalar_lea.vmem [#allocation8], %s1267_s11  ;;  %s1278_s21 = sshll.u32 %s1564_s15, 10 }
  0x7b   : > { %v1822_v5 = vsub.s32 0, %v1819_v3  ;;  %v291_v10 = vsub.s32 1, %v1819_v3  ;;  %v411_v34 = vrot.slane %v1862_v24, 4  ;;  %v1579_v41 = vmov 858989090   ;;  %s1134_s8 = sshll.u32 %s2059_s18, 4  ;;  %s2341_s7 = scalar_lea.hbm %s2395_s3, %s1278_s21  ;;  %s2343_s8 = int_to_ptr.vmem [resolvable:$true] %s1134_s8 }
  0x7c   : > { %v1825_v6 = vsub.s32 %v915_v4, %v1819_v3  ;;  %v407_v27 = vrot.slane %v406_v21, 2  ;;  %v470_v28 = vadd.f32 %v469_v18, %v1845_v15  ;;  %v1878_v42 = vunpack.c.l.s4 %v1579_v41  ;;  %s1118_s25 = scalar_lea.sflag [#allocation4], %s1797_s0  ;;  %s1482_s5 = scalar_lea.vmem %s2343_s8, 1024 }
  0x7d   : > { %v288_v14 = vrot.slane %v1830_v8, %v1822_v5  ;;  %v292_v25 = vrot.slane %v1830_v8, %v291_v10  ;;  %v963_v46 = vunpack.c.0.s8 %v962_v30  ;;  %v412_v48 = vadd.f32 %v411_v34, %v1862_v24  ;;  %p1483_p7 = scmp.ne.s32.totalorder %s2343_s8, %s1482_s5  ;;  %p2417_p8 = scmp.ne.s32.totalorder %s2402_s22, 0 }
  0x7e   : > { %v919_v19 = vrot.slane %v1832_v9, %v1825_v6  ;;  %v926_v20 = vrot.slane %v1835_v11, %v1825_v6  ;;  %v933_v22 = vrot.slane %v1837_v12, %v1825_v6  ;;  %v940_v23 = vrot.slane %v1839_v13, %v1825_v6  ;;  %s1582_s15 = smov [#allocation8]  }
  0x7f   : > { %v1849_v17 = vmul.f32 %v288_v14, %v1828_v7  ;;  %v1869_v33 = vmul.f32 %v292_v25, %v1862_v24  ;;  %v408_v35 = vadd.f32 %v407_v27, %v406_v21  ;;  %v471_v36 = vrot.slane %v470_v28, 2  ;;  %p1484_p11 = pnand %p1483_p7, %p2417_p8  ;;  %s1486_s28 = sshll.u32 %s1582_s15, 4  ;;  %s1487_s28 = int_to_ptr.vmem [resolvable:$false] %s1486_s28 }
  0x80   : > { %v941_v32 = vcombine.high %v919_v19, %v926_v20  ;;  %v942_v37 = vcombine.high %v933_v22, %v940_v23  ;;  %v475_v49 = vrot.slane %v1874_v38, 4  ;;  %v1889_v54 = vsub.s32 2, %v1819_v3  ;;  %s1488_s9 = scalar_lea.vmem %s1487_s28, 2048  ;;  %p1489_p6 = scmp.lt.s32.totalorder %s2343_s8, %s1487_s28 }
  0x81   : > { %v341_v26 = vmul.f32 %v1849_v17, %v1849_v17  ;;  %v342_v40 = vmul.f32 %v1869_v33, %v1869_v33  ;;  %v1882_v43 = vsub.f32 %v1828_v7, %v1849_v17  ;;  %v409_v44 = vrot.slane %v408_v35, 1  ;;  %p1485_p1 = pneg %p1484_p11  ;;  %p1490_p9 = scmp.lt.s32.totalorder %s1488_s9, %s1482_s5 }
  0x82   : > { %v472_v45 = vadd.f32 %v471_v36, %v470_v28  ;;  %v949_v52 = vrot.slane %v941_v32, %v1825_v6  ;;  %v956_v53 = vrot.slane %v942_v37, %v1825_v6  ;;  %v413_v56 = vrot.slane %v412_v48, 2 }
  0x83   : > { %v349_v31 = vmul.f32 0.125, %v341_v26  ;;  %v350_v47 = vmul.f32 0.125, %v342_v40  ;;  %v410_v50 = vadd.f32 %v409_v44, %v408_v35  ;;  %v476_v57 = vadd.f32 %v475_v49, %v1874_v38  ;;  %p1491_p4 = por %p1490_p9, %p1489_p6 }
  0x84   : > { %v473_v51 = vrot.slane %v472_v45, 1  ;;  %v525_v60 = vmul.f32 %v1882_v43, %v1882_v43  ;;  %v1896_v61 = vsub.s32 4, %v1819_v3  ;;  %v966_v63 = vsub.s32 %v963_v46, %v1819_v3 }
  0x85   : > { %v357_v39 = vadd.f32 1e-05, %v349_v31  ;;  %v358_v55 = vadd.f32 1e-05, %v350_v47  ;;  %v453_v58 = vsub.f32 %v410_v50, %v1849_v17  ;;  %v414_v0 = vadd.f32 %v413_v56, %v412_v48  ;;  %p1492_p12 = pnand %p1491_p4, %p1485_p1 }
  0x86   : > { %v474_v59 = vadd.f32 %v473_v51, %v472_v45  ;;  %v477_v1 = vrot.slane %v476_v57, 2  ;;  %v957_v10 = vcombine.low %v949_v52, %v956_v53  ;;  %v1907_v14 = vsub.f32 %v1862_v24, %v1869_v33 }
  0x87   : > { %1362 = vrsqrt.f32 %v357_v39  ;;  %v1903_v4 = vmul.f32 0.125, %v453_v58  ;;  %v415_v16 = vrot.slane %v414_v0, 1  ;;  %v296_v19 = vrot.slane %v1830_v8, %v1889_v54 }
  0x88   : > { %1364 = vrsqrt.f32 %v358_v55  ;;  %v517_v2 = vsub.f32 %v474_v59, %v1845_v15  ;;  %v478_v18 = vadd.f32 %v477_v1, %v476_v57  ;;  %v417_v20 = vrot.slane %v1899_v62, 4 }
  0x89   : > { %v389_v21 = vmul.f32 0.875, %v1849_v17  ;;  %v549_v23 = vmul.f32 %v1903_v4, %v453_v58  ;;  %v889_v15 = vsub.f32 %v1882_v43, %v1903_v4  ;;  %v1917_v25 = vsub.s32 6, %v1819_v3 }
  0x8a   : > { %v533_v22 = vadd.f32 %v525_v60, %v517_v2  ;;  %v416_v26 = vadd.f32 %v415_v16, %v414_v0  ;;  %v479_v27 = vrot.slane %v478_v18, 1  ;;  %v970_v28 = vunpack.c.0.s8 %v1878_v42 }
  0x8b   : > { %v1921_v30 = vmul.f32 %v957_v10, %v1830_v8  ;;  %v418_v31 = vadd.f32 %v417_v20, %v1899_v62  ;;  %v299_v32 = vsub.s32 3, %v1819_v3  ;;  %v526_v37 = vmul.f32 %v1907_v14, %v1907_v14  ;;  %v1965_v20 = vld [vmem:[%s1803_s19 + $0x18] sm:$0xff] }
  0x8c   : > { %v557_v29 = vsub.f32 %v533_v22, %v549_v23  ;;  %v454_v35 = vsub.f32 %v416_v26, %v1869_v33  ;;  %v480_v36 = vadd.f32 %v479_v27, %v478_v18  ;;  %v1929_v39 = vmul.f32 %v296_v19, %v1899_v62 }
  0x8d   : > { %v724_v42 = vrot.slane %v1832_v9, %v1822_v5  ;;  %v390_v44 = vmul.f32 0.875, %v1869_v33  ;;  %v1943_v48 = vmul.f32 %v1899_v62, %v1899_v62  ;;  %v1947_v50 = vrot.slane %v1832_v9, %v1889_v54 }
  0x8e   : > { %v565_v41 = vmul.f32 0.14285715, %v557_v29  ;;  %v518_v45 = vsub.f32 %v480_v36, %v1874_v38  ;;  %v1937_v46 = vmul.f32 0.125, %v454_v35  ;;  %v343_v47 = vmul.f32 %v1929_v39, %v1929_v39 }
  0x8f   : > { %v419_v51 = vrot.slane %v418_v31, 2  ;;  %v973_v52 = vsub.s32 %v970_v28, %v1819_v3  ;;  %v967_v38 = vrot.slane %v1921_v30, %v966_v63  ;;  %v1955_v59 = vrot.slane %v724_v42, %v1822_v5 }
  0x90   : > { %v573_v49 = vmax.f32 %v565_v41, 0.0  ;;  %v534_v55 = vadd.f32 %v526_v37, %v518_v45  ;;  %v550_v56 = vmul.f32 %v1937_v46, %v454_v35  ;;  %v890_v57 = vsub.f32 %v1907_v14, %v1937_v46 }
  0x91   : > { %v1363_v34 = vpop.eup %1362  ;;  %v351_v0 = vmul.f32 0.125, %v343_v47  ;;  %v844_v1 = vrot.slane %v1947_v50, %v1889_v54  ;;  %v420_v10 = vadd.f32 %v419_v51, %v418_v31  ;;  %v481_v63 = vrot.slane %v1943_v48, 4 }
  0x92   : > { %v1931_v40 = vmul.f32 %v1363_v34, %v389_v21  ;;  %v1365_v53 = vpop.eup %1364  ;;  %v581_v58 = vadd.f32 1e-05, %v573_v49  ;;  %v558_v2 = vsub.f32 %v534_v55, %v550_v56  ;;  %v373_v16 = vmul.f32 -0.125, %v1849_v17 }
  0x93   : > { %v1957_v60 = vmul.f32 %v1365_v53, %v390_v44  ;;  %v374_v18 = vmul.f32 -0.125, %v1869_v33  ;;  %v359_v19 = vadd.f32 1e-05, %v351_v0  ;;  %v1968_v21 = vadd.f32 %v967_v38, %v1832_v9 }
  0x94   : > { %1366 = vrsqrt.f32 %v581_v58  ;;  %v566_v22 = vmul.f32 0.14285715, %v558_v2  ;;  %v421_v23 = vrot.slane %v420_v10, 1  ;;  %v482_v26 = vadd.f32 %v481_v63, %v1943_v48 }
  0x95   : > { %v600_v27 = vrot.slane %v1903_v4, %v1822_v5  ;;  %1368 = vrsqrt.f32 %v359_v19  ;;  %v974_v28 = vrot.slane %v1921_v30, %v973_v52  ;;  %v300_v17 = vrot.slane %v1830_v8, %v299_v32 }
  0x96   : > { %v574_v29 = vmax.f32 %v566_v22, 0.0  ;;  %v422_v33 = vadd.f32 %v421_v23, %v420_v10  ;;  %v483_v31 = vrot.slane %v482_v26, 2  ;;  %v423_v35 = vrot.slane %v1965_v20, 4 }
  0x97   : > { %v381_v36 = vmul.f32 %v1363_v34, %v373_v16  ;;  %v1977_v37 = vadd.f32 %v974_v28, %v1835_v11  ;;  %v1980_v41 = vmul.f32 %v300_v17, %v1965_v20  ;;  %v1984_v42 = vmul.f32 %v1965_v20, %v1965_v20 }
  0x98   : > { %v582_v44 = vadd.f32 1e-05, %v574_v29  ;;  %v455_v45 = vsub.f32 %v422_v33, %v1929_v39  ;;  %v484_v32 = vadd.f32 %v483_v31, %v482_v26  ;;  %v424_v47 = vadd.f32 %v423_v35, %v1965_v20 }
  0x99   : > { %v1004_v49 = vrot.slane %v1968_v21, %v1822_v5  ;;  %v728_v34 = vrot.slane %v1832_v9, %v1896_v61  ;;  %v1994_v51 = vsub.f32 %v1899_v62, %v1929_v39  ;;  %v344_v52 = vmul.f32 %v1980_v41, %v1980_v41 }
  0x9a   : > { %v629_v38 = vsub.f32 %v1828_v7, %v600_v27  ;;  %1370 = vrsqrt.f32 %v582_v44  ;;  %v485_v55 = vrot.slane %v484_v32, 1  ;;  %v1999_v56 = vmul.f32 0.125, %v455_v45 }
  0x9b   : > { %v680_v58 = vrot.slane %v381_v36, %v1822_v5  ;;  %v352_v0 = vmul.f32 0.125, %v344_v52  ;;  %v425_v2 = vrot.slane %v424_v47, 2  ;;  %v487_v10 = vrot.slane %v1984_v42, 4 }
  0x9c   : > { %v604_v63 = vrot.slane %v1937_v46, %v1822_v5  ;;  %v391_v16 = vmul.f32 0.875, %v1929_v39  ;;  %v486_v19 = vadd.f32 %v485_v55, %v484_v32  ;;  %v891_v22 = vsub.f32 %v1994_v51, %v1999_v56 }
  0x9d   : > { %v527_v23 = vmul.f32 %v1994_v51, %v1994_v51  ;;  %v360_v26 = vadd.f32 1e-05, %v352_v0  ;;  %v426_v27 = vadd.f32 %v425_v2, %v424_v47  ;;  %v488_v28 = vadd.f32 %v487_v10, %v1984_v42 }
  0x9e   : > { %v1367_v7 = vpop.eup %1366  ;;  %v382_v33 = vmul.f32 %v1365_v53, %v374_v18  ;;  %v519_v31 = vsub.f32 %v486_v19, %v1943_v48  ;;  %v551_v36 = vmul.f32 %v1999_v56, %v455_v45  ;;  %v2025_v43 = vsub.f32 %v1965_v20, %v1980_v41  ;;  %v2030_v18 = vld [vmem:[%s1803_s19 + $0x20] sm:$0xff] }
  0x9f   : > { %v640_v17 = vrot.slane %v1367_v7, %v1822_v5  ;;  %v897_v29 = vmul.f32 %v1367_v7, %v889_v15  ;;  %v2016_v35 = vpop.eup %1368  ;;  %1372 = vrsqrt.f32 %v360_v26  ;;  %v427_v44 = vrot.slane %v426_v27, 1 }
  0xa0   : > { %v489_v32 = vrot.slane %v488_v28, 2  ;;  %v2021_v55 = vmul.f32 %v2016_v35, %v391_v16  ;;  %v808_v4 = vrot.slane %v1832_v9, %v1917_v25  ;;  %v535_v15 = vadd.f32 %v527_v23, %v519_v31 }
  0xa1   : > { %v669_v47 = vmul.f32 %v640_v17, %v629_v38  ;;  %v905_v52 = vadd.f32 %v897_v29, %v1931_v40  ;;  %v428_v48 = vadd.f32 %v427_v44, %v426_v27  ;;  %v630_v38 = vsub.f32 %v1862_v24, %v604_v63 }
  0xa2   : > { %v490_v53 = vadd.f32 %v489_v32, %v488_v28  ;;  %v1008_v40 = vrot.slane %v1968_v21, %v1896_v61  ;;  %v684_v2 = vrot.slane %v382_v33, %v1822_v5  ;;  %v559_v10 = vsub.f32 %v535_v15, %v551_v36 }
  0xa3   : > { %v709_v45 = vadd.f32 %v680_v58, %v669_v47  ;;  %v1041_v0 = vmul.f32 %v1004_v49, %v905_v52  ;;  %v456_v16 = vsub.f32 %v428_v48, %v1980_v41  ;;  %v528_v49 = vmul.f32 %v2025_v43, %v2025_v43 }
  0xa4   : > { %v491_v19 = vrot.slane %v490_v53, 1  ;;  %v1371_v7 = vpop.eup %1370  ;;  %v429_v24 = vrot.slane %v2030_v18, 4  ;;  %v567_v63 = vmul.f32 0.14285715, %v559_v10  ;;  %v768_v27 = vrot.slane %v728_v34, %v1822_v5 }
  0xa5   : > { %v793_v9 = vmul.f32 %v1955_v59, %v709_v45  ;;  %v2039_v23 = vadd.f32 %v1041_v0, %v1947_v50  ;;  %v644_v21 = vrot.slane %v1371_v7, %v1822_v5  ;;  %v898_v58 = vmul.f32 %v1371_v7, %v890_v57 }
  0xa6   : > { %v492_v26 = vadd.f32 %v491_v19, %v490_v53  ;;  %v392_v28 = vmul.f32 0.875, %v1980_v41  ;;  %v2053_v17 = vmul.f32 0.125, %v456_v16  ;;  %v575_v31 = vmax.f32 %v567_v63, 0.0 }
  0xa7   : > { %v873_v59 = vadd.f32 %v844_v1, %v793_v9  ;;  %v670_v29 = vmul.f32 %v644_v21, %v630_v38  ;;  %v906_v33 = vadd.f32 %v898_v58, %v1957_v60  ;;  %v848_v14 = vrot.slane %v808_v4, %v1889_v54 }
  0xa8   : > { %v520_v36 = vsub.f32 %v492_v26, %v1984_v42  ;;  %v552_v46 = vmul.f32 %v2053_v17, %v456_v16  ;;  %v892_v50 = vsub.f32 %v2025_v43, %v2053_v17  ;;  %v430_v57 = vadd.f32 %v429_v24, %v2030_v18 }
  0xa9   : > { %881 = vst [vmem:[%s2059_s18] sm:$0xff] %v873_v59  ;;  %v1373_v1 = vpop.eup %1372  ;;  %v710_v34 = vadd.f32 %v684_v2, %v670_v29  ;;  %v1042_v60 = vmul.f32 %v1008_v40, %v906_v33  ;;  %v583_v44 = vadd.f32 1e-05, %v575_v31  ;;  %v375_v48 = vmul.f32 -0.125, %v1929_v39  ;;  %v2084_v39 = vld [vmem:[%s1803_s19 + $0x28] sm:$0xff] }
  0xaa   : > { %v536_v42 = vadd.f32 %v528_v49, %v520_v36  ;;  %v2067_v32 = vmul.f32 %v1373_v1, %v392_v28  ;;  %v304_v53 = vrot.slane %v1830_v8, %v1896_v61  ;;  %v431_v40 = vrot.slane %v430_v57, 2 }
  0xab   : > { %v794_v47 = vmul.f32 %v768_v27, %v710_v34  ;;  %v2069_v52 = vadd.f32 %v1042_v60, %v808_v4  ;;  %1374 = vrsqrt.f32 %v583_v44  ;;  %v732_v2 = vrot.slane %v1835_v11, %v1822_v5 }
  0xac   : > { %v560_v15 = vsub.f32 %v536_v42, %v552_v46  ;;  %v2080_v4 = vmul.f32 %v2030_v18, %v2030_v18  ;;  %v432_v16 = vadd.f32 %v431_v40, %v430_v57  ;;  %v608_v19 = vrot.slane %v1999_v56, %v1822_v5 }
  0xad   : > { %v874_v45 = vadd.f32 %v848_v14, %v794_v47  ;;  %v1065_v0 = vcombine.low %v2039_v23, %v2069_v52  ;;  %v307_v9 = vsub.s32 5, %v1819_v3  ;;  %v383_v49 = vmul.f32 %v2016_v35, %v375_v48 }
  0xae   : > { %v568_v38 = vmul.f32 0.14285715, %v560_v15  ;;  %v493_v7 = vrot.slane %v2080_v4, 4  ;;  %v2092_v21 = vmul.f32 %v304_v53, %v2030_v18  ;;  %v433_v58 = vrot.slane %v432_v16, 1 }
  0xaf   : > { %882 = vst [vmem:[%s2059_s18 + $0x8] sm:$0xff] %v874_v45  ;;  %v772_v63 = vrot.slane %v732_v2, %v1822_v5  ;;  %v435_v59 = vrot.slane %v2084_v39, 4  ;;  %v2099_v27 = vmul.f32 %v2084_v39, %v2084_v39  ;;  %v812_v28 = vrot.slane %v1835_v11, %v1889_v54 }
  0xb0   : > { %v576_v10 = vmax.f32 %v568_v38, 0.0  ;;  %v494_v26 = vadd.f32 %v493_v7, %v2080_v4  ;;  %v1012_v35 = vrot.slane %v1977_v37, %v1822_v5  ;;  %v434_v29 = vadd.f32 %v433_v58, %v432_v16 }
  0xb1   : > { %v631_v33 = vsub.f32 %v1899_v62, %v608_v19  ;;  %v376_v31 = vmul.f32 -0.125, %v1980_v41  ;;  %v436_v14 = vadd.f32 %v435_v59, %v2084_v39  ;;  %v688_v57 = vrot.slane %v383_v49, %v1822_v5 }
  0xb2   : > { %v584_v24 = vadd.f32 1e-05, %v576_v10  ;;  %v495_v36 = vrot.slane %v494_v26, 2  ;;  %v2111_v34 = vsub.f32 %v2030_v18, %v2092_v21  ;;  %v457_v60 = vsub.f32 %v434_v29, %v2092_v21 }
  0xb3   : > { %v499_v44 = vrot.slane %v2099_v27, 4  ;;  %v612_v41 = vrot.slane %v2053_v17, %v1822_v5  ;;  %v345_v15 = vmul.f32 %v2092_v21, %v2092_v21  ;;  %v308_v53 = vrot.slane %v1830_v8, %v307_v9 }
  0xb4   : > { %1376 = vrsqrt.f32 %v584_v24  ;;  %v496_v47 = vadd.f32 %v495_v36, %v494_v26  ;;  %v2123_v48 = vmul.f32 0.125, %v457_v60  ;;  %v437_v45 = vrot.slane %v436_v14, 2 }
  0xb5   : > { %v1375_v46 = vpop.eup %1374  ;;  %v852_v40 = vrot.slane %v812_v28, %v1889_v54  ;;  %v384_v51 = vmul.f32 %v1373_v1, %v376_v31  ;;  %v736_v56 = vrot.slane %v1835_v11, %v1896_v61  ;;  %v500_v16 = vadd.f32 %v499_v44, %v2099_v27 }
  0xb6   : > { %v648_v42 = vrot.slane %v1375_v46, %v1822_v5  ;;  %v899_v62 = vmul.f32 %v1375_v46, %v891_v22  ;;  %v497_v10 = vrot.slane %v496_v47, 1  ;;  %v529_v22 = vmul.f32 %v2111_v34, %v2111_v34 }
  0xb7   : > { %v438_v9 = vadd.f32 %v437_v45, %v436_v14  ;;  %v632_v24 = vsub.f32 %v1965_v20, %v612_v41  ;;  %v353_v58 = vmul.f32 0.125, %v345_v15  ;;  %v2136_v1 = vmul.f32 %v308_v53, %v2084_v39 }
  0xb8   : > { %v671_v38 = vmul.f32 %v648_v42, %v631_v33  ;;  %v907_v2 = vadd.f32 %v899_v62, %v2021_v55  ;;  %v498_v49 = vadd.f32 %v497_v10, %v496_v47  ;;  %v553_v55 = vmul.f32 %v2123_v48, %v457_v60 }
  0xb9   : > { %v439_v33 = vrot.slane %v438_v9, 1  ;;  %v776_v36 = vrot.slane %v736_v56, %v1822_v5  ;;  %v1016_v20 = vrot.slane %v1977_v37, %v1896_v61  ;;  %v501_v14 = vrot.slane %v500_v16, 2 }
  0xba   : > { %v711_v19 = vadd.f32 %v688_v57, %v671_v38  ;;  %v1043_v7 = vmul.f32 %v1012_v35, %v907_v2  ;;  %v521_v29 = vsub.f32 %v498_v49, %v2080_v4  ;;  %v692_v35 = vrot.slane %v384_v51, %v1822_v5  ;;  %v2148_v4 = vld [vmem:[%s1803_s19 + $0x30] sm:$0xff] }
  0xbb   : > { %v361_v60 = vadd.f32 1e-05, %v353_v58  ;;  %v2152_v44 = vsub.f32 %v2084_v39, %v2136_v1  ;;  %v440_v42 = vadd.f32 %v439_v33, %v438_v9  ;;  %v502_v62 = vadd.f32 %v501_v14, %v500_v16  ;;  %v2191_v14 = vld [vmem:[%s1803_s19 + $0x38] sm:$0xff] }
  0xbc   : > { %v795_v26 = vmul.f32 %v772_v63, %v711_v19  ;;  %v1051_v59 = vadd.f32 %v1043_v7, %v812_v28  ;;  %v537_v28 = vadd.f32 %v529_v22, %v521_v29  ;;  %v816_v41 = vrot.slane %v1835_v11, %v1917_v25 }
  0xbd   : > { %v346_v43 = vmul.f32 %v2136_v1, %v2136_v1  ;;  %v458_v17 = vsub.f32 %v440_v42, %v2136_v1  ;;  %v441_v53 = vrot.slane %v2148_v4, 4  ;;  %1378 = vrsqrt.f32 %v361_v60 }
  0xbe   : > { %v1377_v31 = vpop.eup %1376  ;;  %v875_v46 = vadd.f32 %v852_v40, %v795_v26  ;;  %v561_v15 = vsub.f32 %v537_v28, %v553_v55  ;;  %v856_v38 = vrot.slane %v816_v41, %v1889_v54  ;;  %v530_v11 = vmul.f32 %v2152_v44, %v2152_v44 }
  0xbf   : > { %v652_v57 = vrot.slane %v1377_v31, %v1822_v5  ;;  %v900_v63 = vmul.f32 %v1377_v31, %v892_v50  ;;  %v503_v50 = vrot.slane %v502_v62, 1  ;;  %v2171_v51 = vrot.slane %v1065_v0, %v1825_v6 }
  0xc0   : > { %883 = vst [vmem:[%s2059_s18 + $0x10] sm:$0xff] %v875_v46  ;;  %v569_v2 = vmul.f32 0.14285715, %v561_v15  ;;  %v354_v19 = vmul.f32 0.125, %v346_v43  ;;  %v442_v9 = vadd.f32 %v441_v53, %v2148_v4  ;;  %v2178_v26 = vmul.f32 %v2148_v4, %v2148_v4 }
  0xc1   : > { %v672_v37 = vmul.f32 %v652_v57, %v632_v24  ;;  %v908_v47 = vadd.f32 %v900_v63, %v2067_v32  ;;  %v504_v10 = vadd.f32 %v503_v50, %v502_v62  ;;  %v2165_v32 = vmul.f32 0.125, %v458_v17 }
  0xc2   : > { %v577_v16 = vmax.f32 %v569_v2, 0.0  ;;  %v312_v0 = vrot.slane %v1830_v8, %v1917_v25  ;;  %v443_v33 = vrot.slane %v442_v9, 2  ;;  %v377_v31 = vmul.f32 -0.125, %v2092_v21 }
  0xc3   : > { %v712_v45 = vadd.f32 %v692_v35, %v672_v37  ;;  %v1044_v40 = vmul.f32 %v1016_v20, %v908_v47  ;;  %v522_v7 = vsub.f32 %v504_v10, %v2099_v27  ;;  %v554_v49 = vmul.f32 %v2165_v32, %v458_v17 }
  0xc4   : > { %v585_v55 = vadd.f32 1e-05, %v577_v16  ;;  %v362_v27 = vadd.f32 1e-05, %v354_v19  ;;  %v505_v35 = vrot.slane %v2178_v26, 4  ;;  %v444_v20 = vadd.f32 %v443_v33, %v442_v9 }
  0xc5   : > { %v796_v56 = vmul.f32 %v776_v36, %v712_v45  ;;  %v1052_v22 = vadd.f32 %v1044_v40, %v816_v41  ;;  %v538_v23 = vadd.f32 %v530_v11, %v522_v7  ;;  %v2194_v46 = vmul.f32 %v312_v0, %v2148_v4 }
  0xc6   : > { %1380 = vrsqrt.f32 %v585_v55  ;;  %v506_v57 = vadd.f32 %v505_v35, %v2178_v26  ;;  %v616_v28 = vrot.slane %v2123_v48, %v1822_v5  ;;  %v445_v42 = vrot.slane %v444_v20, 1 }
  0xc7   : > { %v876_v24 = vadd.f32 %v856_v38, %v796_v56  ;;  %v1066_v58 = vcombine.low %v1051_v59, %v1052_v22  ;;  %v562_v29 = vsub.f32 %v538_v23, %v554_v49  ;;  %v2197_v63 = vpop.eup %1378  ;;  %1382 = vrsqrt.f32 %v362_v27 }
  0xc8   : > { %v385_v62 = vmul.f32 %v2197_v63, %v377_v31  ;;  %v507_v37 = vrot.slane %v506_v57, 2  ;;  %v447_v41 = vrot.slane %v2191_v14, 4  ;;  %v446_v15 = vadd.f32 %v445_v42, %v444_v20 }
  0xc9   : > { %884 = vst [vmem:[%s2059_s18 + $0x18] sm:$0xff] %v876_v24  ;;  %v2182_v52 = vrot.slane %v1066_v58, %v1825_v6  ;;  %v570_v36 = vmul.f32 0.14285715, %v562_v29  ;;  %v315_v43 = vsub.s32 7, %v1819_v3  ;;  %v2206_v17 = vmul.f32 %v2191_v14, %v2191_v14 }
  0xca   : > { %v2210_v50 = vsub.f32 %v2148_v4, %v2194_v46  ;;  %v508_v53 = vadd.f32 %v507_v37, %v506_v57  ;;  %v448_v45 = vadd.f32 %v447_v41, %v2191_v14  ;;  %v633_v38 = vsub.f32 %v2030_v18, %v616_v28 }
  0xcb   : > { %v1097_v59 = vcombine.low %v2171_v51, %v2182_v52  ;;  %v578_v60 = vmax.f32 %v570_v36, 0.0  ;;  %v740_v40 = vrot.slane %v1837_v12, %v1822_v5  ;;  %v459_v2 = vsub.f32 %v446_v15, %v2194_v46 }
  0xcc   : > { %v696_v11 = vrot.slane %v385_v62, %v1822_v5  ;;  %v347_v56 = vmul.f32 %v2194_v46, %v2194_v46  ;;  %v509_v22 = vrot.slane %v508_v53, 1  ;;  %v316_v18 = vrot.slane %v1830_v8, %v315_v43 }
  0xcd   : > { %v586_v47 = vadd.f32 1e-05, %v578_v60  ;;  %v2224_v19 = vmul.f32 0.125, %v459_v2  ;;  %v511_v7 = vrot.slane %v2206_v17, 4  ;;  %v378_v49 = vmul.f32 -0.125, %v2136_v1 }
  0xce   : > { %v510_v9 = vadd.f32 %v509_v22, %v508_v53  ;;  %v531_v24 = vmul.f32 %v2210_v50, %v2210_v50  ;;  %v449_v58 = vrot.slane %v448_v45, 2  ;;  %v780_v23 = vrot.slane %v740_v40, %v1822_v5 }
  0xcf   : > { %1384 = vrsqrt.f32 %v586_v47  ;;  %v2234_v0 = vrot.slane %v1837_v12, %v1889_v54  ;;  %v620_v27 = vrot.slane %v2165_v32, %v1822_v5  ;;  %v355_v8 = vmul.f32 0.125, %v347_v56 }
  0xd0   : > { %v2217_v10 = vpop.eup %1380  ;;  %v523_v29 = vsub.f32 %v510_v9, %v2178_v26  ;;  %v555_v33 = vmul.f32 %v2224_v19, %v459_v2  ;;  %v450_v31 = vadd.f32 %v449_v58, %v448_v45  ;;  %v2245_v57 = vmul.f32 %v316_v18, %v2191_v14 }
  0xd1   : > { %v656_v16 = vrot.slane %v2217_v10, %v1822_v5  ;;  %v2240_v35 = vpop.eup %1382  ;;  %v860_v20 = vrot.slane %v2234_v0, %v1889_v54  ;;  %v512_v28 = vadd.f32 %v511_v7, %v2206_v17  ;;  %v1580_v60 = vmov 1431651396  }
  0xd2   : > { %v976_v42 = vunpack.c.l.s4 %v1580_v60  ;;  %v386_v62 = vmul.f32 %v2240_v35, %v378_v49  ;;  %v539_v37 = vadd.f32 %v531_v24, %v523_v29  ;;  %v744_v41 = vrot.slane %v1837_v12, %v1896_v61 }
  0xd3   : > { %v673_v55 = vmul.f32 %v656_v16, %v633_v38  ;;  %v451_v47 = vrot.slane %v450_v31, 1  ;;  %v513_v15 = vrot.slane %v512_v28, 2  ;;  %v634_v43 = vsub.f32 %v2084_v39, %v620_v27 }
  0xd4   : > { %v363_v53 = vadd.f32 1e-05, %v355_v8  ;;  %v563_v45 = vsub.f32 %v539_v37, %v555_v33  ;;  %v2254_v2 = vsub.f32 %v2191_v14, %v2245_v57  ;;  %v977_v22 = vunpack.c.0.s8 %v976_v42 }
  0xd5   : > { %v713_v36 = vadd.f32 %v696_v11, %v673_v55  ;;  %v452_v11 = vadd.f32 %v451_v47, %v450_v31  ;;  %v514_v56 = vadd.f32 %v513_v15, %v512_v28  ;;  %v700_v18 = vrot.slane %v386_v62, %v1822_v5 }
  0xd6   : > { %v571_v7 = vmul.f32 0.14285715, %v563_v45  ;;  %v784_v49 = vrot.slane %v744_v41, %v1822_v5  ;;  %v348_v39 = vmul.f32 %v2245_v57, %v2245_v57  ;;  %v2265_v55 = vrot.slane %v1837_v12, %v1917_v25 }
  0xd7   : > { %v797_v26 = vmul.f32 %v780_v23, %v713_v36  ;;  %v460_v9 = vsub.f32 %v452_v11, %v2245_v57  ;;  %v515_v24 = vrot.slane %v514_v56, 1  ;;  %1386 = vrsqrt.f32 %v363_v53 }
  0xd8   : > { %v579_v23 = vmax.f32 %v571_v7, 0.0  ;;  %v532_v8 = vmul.f32 %v2254_v2, %v2254_v2  ;;  %v864_v31 = vrot.slane %v2265_v55, %v1889_v54  ;;  %v356_v60 = vmul.f32 0.125, %v348_v39 }
  0xd9   : > { %v1385_v38 = vpop.eup %1384  ;;  %v877_v40 = vadd.f32 %v860_v20, %v797_v26  ;;  %v516_v27 = vadd.f32 %v515_v24, %v514_v56  ;;  %v2269_v29 = vmul.f32 0.125, %v460_v9  ;;  %v1581_v20 = vmov 2004313702  }
  0xda   : > { %v660_v16 = vrot.slane %v1385_v38, %v1822_v5  ;;  %v587_v36 = vadd.f32 1e-05, %v579_v23  ;;  %v983_v28 = vunpack.c.l.s4 %v1581_v20  ;;  %v980_v37 = vsub.s32 %v977_v22, %v1819_v3 }
  0xdb   : > { %885 = vst [vmem:[%s2059_s18 + $0x20] sm:$0xff] %v877_v40  ;;  %v524_v42 = vsub.f32 %v516_v27, %v2206_v17  ;;  %v556_v62 = vmul.f32 %v2269_v29, %v460_v9  ;;  %v364_v53 = vadd.f32 1e-05, %v356_v60  ;;  %v393_v40 = vmul.f32 0.875, %v2092_v21 }
  0xdc   : > { %v674_v58 = vmul.f32 %v660_v16, %v634_v43  ;;  %1388 = vrsqrt.f32 %v587_v36  ;;  %v984_v15 = vunpack.c.0.s8 %v983_v28  ;;  %v379_v43 = vmul.f32 -0.125, %v2194_v46 }
  0xdd   : > { %v540_v41 = vadd.f32 %v532_v8, %v524_v42  ;;  %v981_v11 = vrot.slane %v1921_v30, %v980_v37  ;;  %v394_v56 = vmul.f32 0.875, %v2136_v1  ;;  %v893_v17 = vsub.f32 %v2111_v34, %v2123_v48 }
  0xde   : > { %v714_v33 = vadd.f32 %v700_v18, %v674_v58  ;;  %v894_v22 = vsub.f32 %v2152_v44, %v2165_v32  ;;  %v624_v16 = vrot.slane %v2224_v19, %v1822_v5  ;;  %1390 = vrsqrt.f32 %v364_v53 }
  0xdf   : > { %v564_v45 = vsub.f32 %v540_v41, %v556_v62  ;;  %v401_v9 = vmul.f32 %v2197_v63, %v393_v40  ;;  %v995_v1 = vadd.f32 %v981_v11, %v1837_v12  ;;  %v402_v24 = vmul.f32 %v2240_v35, %v394_v56 }
  0xe0   : > { %v798_v26 = vmul.f32 %v784_v49, %v714_v33  ;;  %v987_v49 = vsub.s32 %v984_v15, %v1819_v3  ;;  %v748_v34 = vrot.slane %v1839_v13, %v1822_v5  ;;  %v901_v48 = vmul.f32 %v2217_v10, %v893_v17 }
  0xe1   : > { %v572_v18 = vmul.f32 0.14285715, %v564_v45  ;;  %v1387_v7 = vpop.eup %1386  ;;  %v902_v44 = vmul.f32 %v1385_v38, %v894_v22  ;;  %v635_v32 = vsub.f32 %v2148_v4, %v624_v16  ;;  %v395_v3 = vmul.f32 0.875, %v2194_v46 }
  0xe2   : > { %v878_v47 = vadd.f32 %v864_v31, %v798_v26  ;;  %v387_v39 = vmul.f32 %v1387_v7, %v379_v43  ;;  %v895_v27 = vsub.f32 %v2210_v50, %v2224_v19  ;;  %v988_v63 = vrot.slane %v1921_v30, %v987_v49 }
  0xe3   : > { %v580_v21 = vmax.f32 %v572_v18, 0.0  ;;  %v1020_v8 = vrot.slane %v995_v1, %v1822_v5  ;;  %v1024_v10 = vrot.slane %v995_v1, %v1896_v61  ;;  %v828_v4 = vrot.slane %v1839_v13, %v1889_v54 }
  0xe4   : > { %886 = vst [vmem:[%s2059_s18 + $0x28] sm:$0xff] %v878_v47  ;;  %v704_v35 = vrot.slane %v387_v39, %v1822_v5  ;;  %v909_v38 = vadd.f32 %v901_v48, %v401_v9  ;;  %v910_v33 = vadd.f32 %v902_v44, %v402_v24  ;;  %v788_v31 = vrot.slane %v748_v34, %v1822_v5 }
  0xe5   : > { %v588_v58 = vadd.f32 1e-05, %v580_v21  ;;  %v403_v50 = vmul.f32 %v1387_v7, %v395_v3  ;;  %v996_v30 = vadd.f32 %v988_v63, %v1839_v13  ;;  %v380_v36 = vmul.f32 -0.125, %v2245_v57 }
  0xe6   : > { %v1389_v23 = vpop.eup %1388  ;;  %v868_v28 = vrot.slane %v828_v4, %v1889_v54  ;;  %v396_v60 = vmul.f32 0.875, %v2245_v57  ;;  %v628_v42 = vrot.slane %v2269_v29, %v1822_v5  ;;  %v1045_v37 = vmul.f32 %v1020_v8, %v909_v38 }
  0xe7   : > { %v664_v12 = vrot.slane %v1389_v23, %v1822_v5  ;;  %1392 = vrsqrt.f32 %v588_v58  ;;  %v903_v19 = vmul.f32 %v1389_v23, %v895_v27  ;;  %v1046_v26 = vmul.f32 %v1024_v10, %v910_v33 }
  0xe8   : > { %v1391_v62 = vpop.eup %1390  ;;  %v1028_v15 = vrot.slane %v996_v30, %v1822_v5  ;;  %v896_v53 = vsub.f32 %v2254_v2, %v2269_v29  ;;  %v636_v11 = vsub.f32 %v2191_v14, %v628_v42  ;;  %v752_v57 = vrot.slane %v1839_v13, %v1896_v61 }
  0xe9   : > { %v675_v46 = vmul.f32 %v664_v12, %v635_v32  ;;  %v911_v47 = vadd.f32 %v903_v19, %v403_v50  ;;  %v388_v43 = vmul.f32 %v1391_v62, %v380_v36  ;;  %v404_v40 = vmul.f32 %v1391_v62, %v396_v60 }
  0xea   : > { %v1053_v17 = vadd.f32 %v1045_v37, %v2234_v0  ;;  %v1054_v22 = vadd.f32 %v1046_v26, %v2265_v55  ;;  %v1032_v16 = vrot.slane %v996_v30, %v1896_v61  ;;  %v832_v14 = vrot.slane %v1839_v13, %v1917_v25 }
  0xeb   : > { %v715_v20 = vadd.f32 %v704_v35, %v675_v46  ;;  %v1047_v18 = vmul.f32 %v1028_v15, %v911_v47  ;;  %v708_v2 = vrot.slane %v388_v43, %v1822_v5  ;;  %v792_v39 = vrot.slane %v752_v57, %v1822_v5 }
  0xec   : > { %v872_v55 = vrot.slane %v832_v14, %v1889_v54  ;;  %v1067_v21 = vcombine.low %v1053_v17, %v1054_v22  ;;  %v1105_v54 = vrot.slane %v1097_v59, %v1825_v6 }
  0xed   : > { %v799_v41 = vmul.f32 %v788_v31, %v715_v20  ;;  %v1055_v61 = vadd.f32 %v1047_v18, %v828_v4 }
  0xee   : > { %v1089_v48 = vrot.slane %v1067_v21, %v1825_v6 }
  0xef   : > { %v879_v45 = vadd.f32 %v868_v28, %v799_v41 }
  0xf1   : > { %v1393_v56 = vpop.eup %1392  ;;  %887 = vst [vmem:[%s2059_s18 + $0x30] sm:$0xff] %v879_v45 }
  0xf2   : > { %v668_v7 = vrot.slane %v1393_v56, %v1822_v5  ;;  %v904_v29 = vmul.f32 %v1393_v56, %v896_v53 }
  0xf4   : > { %v676_v49 = vmul.f32 %v668_v7, %v636_v11  ;;  %v912_v0 = vadd.f32 %v904_v29, %v404_v40 }
  0xf6   : > { %v716_v9 = vadd.f32 %v708_v2, %v676_v49  ;;  %v1048_v1 = vmul.f32 %v1032_v16, %v912_v0 }
  0xf8   : > { %v800_v24 = vmul.f32 %v792_v39, %v716_v9  ;;  %v1056_v34 = vadd.f32 %v1048_v1, %v832_v14 }
  0xfa   : > { %v880_v13 = vadd.f32 %v872_v55, %v800_v24  ;;  %v1068_v25 = vcombine.low %v1055_v61, %v1056_v34 }
  0xfc   : > { %888 = vst [vmem:[%s2059_s18 + $0x38] sm:$0xff] %v880_v13  ;;  %v1096_v5 = vrot.slane %v1068_v25, %v1825_v6 }
  0xfe   : > { %v1098_v44 = vcombine.low %v1089_v48, %v1096_v5 }
 0x100   : > { %v1112_v32 = vrot.slane %v1098_v44, %v1825_v6 }
 0x102   : > { %v1113_v58 = vcombine.low %v1105_v54, %v1112_v32 }
 0x104   : > { %1115 = vst [vmem:[%s2059_s18] ss:$8 sm:$0xf] %v1113_v58  ;;  %1116 = vst [vmem:[%s2059_s18] ss:$8 sm:$0xf0] %v1113_v58 }
 0x105   : > { %1495 = shalt.err (!%p1492_p12)
}
 0x106   : > { %s1496_s0 = scalar_lea.hbm %s2341_s7, 1024  ;;  %s1500_s19 = scalar_lea.hbm %s2395_s3, 2048 }
 0x107   : > { %p1497_p2 = scmp.ne.s32.totalorder %s2341_s7, %s1496_s0  ;;  %p1501_p3 = scmp.lt.u32.totalorder %s2341_s7, %s2395_s3 }
 0x108   : > { %p1502_p10 = scmp.lt.u32.totalorder %s1500_s19, %s1496_s0  ;;  %p1504_p7 = scmp.lt.u32.totalorder %s1496_s0, %s2341_s7 }
 0x109   : > { %p1498_p13 = pnand %p1497_p2, %p2417_p8 }
 0x10a   : > { %p1503_p5 = por %p1502_p10, %p1501_p3 }
 0x10b   : > { %p1499_p0 = pneg %p1498_p13 }
 0x10c   : > { %p1505_p11 = por %p1504_p7, %p1503_p5 }
 0x10e   : > { %p1506_p1 = pnand %p1505_p11, %p1499_p0 }
 0x110   : > { %1509 = shalt.err (!%p1506_p1)
}
 0x111   : > { %1287 = dma.vmem_to_hbm [thread:$0]  (%p2417_p8), %s2343_s8, 1024, %s2341_s7, %s1118_s25  }
 0x112 PF: > { %s1146_s20 = sand.u32 1, %s1552_s12   ;;  %p2418_p6 = scmp.ne.s32.totalorder %s2403_s23, 0 }
 0x113   : > { %p2419_p9 = scmp.ge.s32.totalorder %s1572_s17, 2  ;;  %s1147_s30 = scalar_lea.sflag [#allocation4], %s1146_s20 }
 0x115   : > { %p1301_p4 = pnand %p2419_p9, %p2418_p6 }
 0x117   : > { %1547 = dma.done.wait (!%p1301_p4), %s1147_s30, 1024  }
 0x118   : > { %1549 = vsyncadd (!%p1301_p4), %s1147_s30, 4294966272  ;;  %s22_s17 = sadd.s32 1, %s1572_s17   ;;  %s2420_s12 = smov %s1556_s13 }
 0x119   : > { %p19_p12 = scmp.ge.s32.totalorder %s22_s17, 4   ;;  %s2421_s13 = smov %s1560_s14 }
 0x11a   : > { %s2422_s14 = smov %s1725_s26  ;;  %s2423_s15 = smov %s1568_s16 }
 0x11b   : > { %s2424_s16 = smov %s2426_s27  ;;  %21 = sbr.rel (!%p19_p12) target bundleno = 10 (0xa), region = 95 }
 0x122   :  { %1152 = vsyncpa [#allocation3], 1 }
 0x123   :  { %1154 = vsyncpa [#allocation3 + $0x1], 1 }
 0x124   :  { %1155 = vsyncpa [#allocation6], 1 }
 0x125   :  { %1157 = vsyncpa [#allocation6 + $0x1], 1 }
 0x126   :  { %1158 = vsyncpa [#allocation4], 1 }
 0x127   :  { %1160 = vsyncpa [#allocation4 + $0x1], 1 }

</bundles_post_ra>
